<compile_context>
chip_gen: v5e
topology: v5e:2x2
jax: 0.10.0
libtpu: 0.0.40
codegen_flags: <defaults>
</compile_context>

<pallas_src>
import jax
import jax.numpy as jnp
from jax.experimental import pallas as pl
from jax.experimental.pallas import tpu as pltpu


def _round_up(x, m):
    return ((x + m - 1) // m) * m


def _stats_kernel(r1_ref, r2_ref,
                  w1a_ref, w1b_ref, b1_ref,
                  w2_ref, b2_ref,
                  w3_ref, b3_ref,
                  out_ref):
    cdt = w1a_ref.dtype  # compute dtype for the MXU matmuls (bf16 or f32)

    # ---- linear1 (concat folded into two matmuls) + ReLU ------------------
    h1 = (jnp.dot(r1_ref[...].astype(cdt), w1a_ref[...],
                  preferred_element_type=jnp.float32)
          + jnp.dot(r2_ref[...].astype(cdt), w1b_ref[...],
                    preferred_element_type=jnp.float32)
          + b1_ref[...])
    h1 = jnp.maximum(h1, 0.0)

    # ---- linear2 + ReLU (MXU, f32 accumulation) ---------------------------
    h2 = jnp.dot(h1.astype(cdt), w2_ref[...],
                 preferred_element_type=jnp.float32) + b2_ref[...]
    h2 = jnp.maximum(h2, 0.0)

    # ---- linear3 (256 -> 1) on VPU/XLU: mul + lane reduce, not the MXU ----
    out_ref[...] = (jnp.sum(h2 * w3_ref[...], axis=-1, keepdims=True)
                    + b3_ref[0])


def statistics_net(repre1, repre2, params, *, block_b=512,
                   compute_dtype=jnp.bfloat16):
    """Pallas forward pass of StatisticsNet. Returns (B, 1) float32."""
    w1, b1, w2, b2, w3, b3 = params
    B, c1 = repre1.shape
    c2 = repre2.shape[1]
    hidden = w1.shape[1]

    # Fold torch.cat into the first layer; pre-cast the big weights once.
    w1a = w1[:c1].astype(compute_dtype)
    w1b = w1[c1:].astype(compute_dtype)
    w2c = w2.astype(compute_dtype)
    w3_row = w3.reshape(1, hidden).astype(jnp.float32)     # (H,1) -> (1,H)
    b1r = b1.reshape(1, hidden).astype(jnp.float32)
    b2r = b2.reshape(1, hidden).astype(jnp.float32)
    b3s = b3.reshape(1).astype(jnp.float32)                 # scalar bias -> SMEM

    # Batch tile: multiple of 8 (sublane), sized to minimize pad waste.
    n_tiles = pl.cdiv(B, block_b)
    tb = _round_up(pl.cdiv(B, n_tiles), 8)
    bp = tb * n_tiles
    if bp != B:
        pad = bp - B
        repre1 = jnp.pad(repre1, ((0, pad), (0, 0)))
        repre2 = jnp.pad(repre2, ((0, pad), (0, 0)))
    grid = (n_tiles,)

    batch = lambda i: (i, 0)       # streamed per grid step
    resident = lambda i: (0, 0)    # weights/biases stay put across grid steps

    flops = 2 * bp * (c1 * hidden + c2 * hidden + hidden * hidden + hidden)
    bytes_accessed = (bp * (c1 + c2 + 1) * 4
                      + (c1 + c2) * hidden * w1a.dtype.itemsize
                      + hidden * hidden * w2c.dtype.itemsize
                      + (3 * hidden + 1) * 4)

    out = pl.pallas_call(
        _stats_kernel,
        out_shape=jax.ShapeDtypeStruct((bp, 1), jnp.float32),
        grid=grid,
        in_specs=[
            pl.BlockSpec((tb, c1), batch),
            pl.BlockSpec((tb, c2), batch),
            pl.BlockSpec((c1, hidden), resident),
            pl.BlockSpec((c2, hidden), resident),
            pl.BlockSpec((1, hidden), resident),
            pl.BlockSpec((hidden, hidden), resident),
            pl.BlockSpec((1, hidden), resident),
            pl.BlockSpec((1, hidden), resident),
            pl.BlockSpec(memory_space=pltpu.MemorySpace.SMEM),
        ],
        out_specs=pl.BlockSpec((tb, 1), batch),
        compiler_params=pltpu.CompilerParams(
            dimension_semantics=("parallel",),
            vmem_limit_bytes=32 * 1024 * 1024),
        cost_estimate=pl.CostEstimate(flops=int(flops), transcendentals=0,
                                      bytes_accessed=int(bytes_accessed)),
    )(repre1, repre2, w1a, w1b, b1r, w2c, b2r, w3_row, b3s)

    return out[:B]


def init_params(key, channel1, channel2):
    """Deterministic init mimicking nn.Linear default (uniform +/- 1/sqrt(fan_in))."""
    def linear(key, fan_in, fan_out):
        kw, kb = jax.random.split(key)
        bound = 1.0 / jnp.sqrt(fan_in)
        w = jax.random.uniform(kw, (fan_in, fan_out), jnp.float32, -bound, bound)
        b = jax.random.uniform(kb, (1, fan_out), jnp.float32, -bound, bound)
        return w, b

    k1, k2, k3 = jax.random.split(key, 3)
    w1, b1 = linear(k1, channel1 + channel2, 256)
    w2, b2 = linear(k2, 256, 256)
    w3, b3 = linear(k3, 256, 1)
    return (w1, b1, w2, b2, w3, b3)


def _reference(repre1, repre2, params):
    w1, b1, w2, b2, w3, b3 = params
    x = jnp.concatenate([repre1, repre2], axis=1)
    x = jnp.maximum(x @ w1 + b1, 0.0)
    x = jnp.maximum(x @ w2 + b2, 0.0)
    return x @ w3 + b3


if __name__ == "__main__":
    B, C1, C2 = 2, 4, 4
    key = jax.random.PRNGKey(0)
    k_p, k_r1, k_r2 = jax.random.split(key, 3)

    params = init_params(k_p, C1, C2)
    repre1 = jax.random.normal(k_r1, (B, C1), jnp.float32)
    repre2 = jax.random.normal(k_r2, (B, C2), jnp.float32)

    ref = _reference(repre1, repre2, params)

    # f32 operand path (tolerance is loose-ish because the XLA reference
    # matmul precision on TPU may itself be reduced-precision).
    out_f32 = jax.block_until_ready(
        statistics_net(repre1, repre2, params, compute_dtype=jnp.float32))
    assert out_f32.shape == (B, 1)
    assert jnp.allclose(out_f32, ref, atol=2e-2, rtol=2e-2)

    # Default bf16-operand / f32-accumulate path: looser tolerance vs f32 ref.
    out_bf16 = jax.block_until_ready(statistics_net(repre1, repre2, params))
    assert out_bf16.shape == (B, 1)
    assert jnp.allclose(out_bf16, ref, atol=5e-2, rtol=5e-2)

    # Multi-tile / ragged-batch path: B=20 with an 8-row batch tile -> 3 grid
    # steps plus padding; exercises the streaming / padding logic.
    B2 = 20
    k_a, k_b = jax.random.split(jax.random.PRNGKey(1))
    ra = jax.random.normal(k_a, (B2, C1), jnp.float32)
    rb = jax.random.normal(k_b, (B2, C2), jnp.float32)
    out_tiled = jax.block_until_ready(
        statistics_net(ra, rb, params, block_b=8, compute_dtype=jnp.float32))
    assert out_tiled.shape == (B2, 1)
    assert jnp.allclose(out_tiled, _reference(ra, rb, params),
                        atol=2e-2, rtol=2e-2)

    print("KERNEL_OK")
</pallas_src>

<mosaic_0001>
module attributes {stable_mosaic.version = 11 : i64} {
  func.func @_stats_kernel(%arg0: i32, %arg1: memref<8x4xf32, #tpu.memory_space<vmem>>, %arg2: memref<8x4xf32, #tpu.memory_space<vmem>>, %arg3: memref<4x256xf32, #tpu.memory_space<vmem>>, %arg4: memref<4x256xf32, #tpu.memory_space<vmem>>, %arg5: memref<1x256xf32, #tpu.memory_space<vmem>>, %arg6: memref<256x256xf32, #tpu.memory_space<vmem>>, %arg7: memref<1x256xf32, #tpu.memory_space<vmem>>, %arg8: memref<1x256xf32, #tpu.memory_space<vmem>>, %arg9: memref<1xf32, #tpu.memory_space<smem>>, %arg10: memref<8x1xf32, #tpu.memory_space<vmem>>) attributes {dimension_semantics = [#tpu.dimension_semantics<parallel>], iteration_bounds = array<i64: 1>, scalar_prefetch = 0 : i64, scratch_operands = 0 : i64, tpu.core_type = #tpu.core_type<tc>, window_params = [{transform_indices = @transform_0, window_bounds = array<i64: 8, 4>}, {transform_indices = @transform_1, window_bounds = array<i64: 8, 4>}, {pipeline_mode = #tpu.pipeline_mode<synchronous>, transform_indices = @transform_2, window_bounds = array<i64: 4, 256>}, {pipeline_mode = #tpu.pipeline_mode<synchronous>, transform_indices = @transform_3, window_bounds = array<i64: 4, 256>}, {pipeline_mode = #tpu.pipeline_mode<synchronous>, transform_indices = @transform_4, window_bounds = array<i64: 1, 256>}, {pipeline_mode = #tpu.pipeline_mode<synchronous>, transform_indices = @transform_5, window_bounds = array<i64: 256, 256>}, {pipeline_mode = #tpu.pipeline_mode<synchronous>, transform_indices = @transform_6, window_bounds = array<i64: 1, 256>}, {pipeline_mode = #tpu.pipeline_mode<synchronous>, transform_indices = @transform_7, window_bounds = array<i64: 1, 256>}, {transform_indices = @transform_8, window_bounds = array<i64: 1>}, {transform_indices = @transform_9, window_bounds = array<i64: 8, 1>}]} {
    %c0 = arith.constant 0 : index
    %c0_0 = arith.constant 0 : index
    %0 = vector.load %arg1[%c0, %c0_0] : memref<8x4xf32, #tpu.memory_space<vmem>>, vector<8x4xf32>
    %c0_1 = arith.constant 0 : index
    %c0_2 = arith.constant 0 : index
    %1 = vector.load %arg3[%c0_1, %c0_2] : memref<4x256xf32, #tpu.memory_space<vmem>>, vector<4x256xf32>
    %cst = arith.constant dense<0.000000e+00> : vector<8x256xf32>
    %2 = tpu.matmul %0, %1, %cst {dimension_numbers = #tpu.dot_dimension_numbers<[1], [0], [0], [1], [0, 0, 1, 1], [], []>} : vector<8x4xf32>, vector<4x256xf32>, vector<8x256xf32> -> vector<8x256xf32>
    %c0_3 = arith.constant 0 : index
    %c0_4 = arith.constant 0 : index
    %3 = vector.load %arg2[%c0_3, %c0_4] : memref<8x4xf32, #tpu.memory_space<vmem>>, vector<8x4xf32>
    %c0_5 = arith.constant 0 : index
    %c0_6 = arith.constant 0 : index
    %4 = vector.load %arg4[%c0_5, %c0_6] : memref<4x256xf32, #tpu.memory_space<vmem>>, vector<4x256xf32>
    %cst_7 = arith.constant dense<0.000000e+00> : vector<8x256xf32>
    %5 = tpu.matmul %3, %4, %cst_7 {dimension_numbers = #tpu.dot_dimension_numbers<[1], [0], [0], [1], [0, 0, 1, 1], [], []>} : vector<8x4xf32>, vector<4x256xf32>, vector<8x256xf32> -> vector<8x256xf32>
    %6 = arith.addf %2, %5 : vector<8x256xf32>
    %c0_8 = arith.constant 0 : index
    %c0_9 = arith.constant 0 : index
    %7 = vector.load %arg5[%c0_8, %c0_9] : memref<1x256xf32, #tpu.memory_space<vmem>>, vector<1x256xf32>
    %8 = vector.broadcast %7 : vector<1x256xf32> to vector<8x256xf32>
    %9 = arith.addf %6, %8 : vector<8x256xf32>
    %cst_10 = arith.constant 0.000000e+00 : f32
    %10 = vector.broadcast %cst_10 : f32 to vector<8x256xf32>
    %11 = arith.maximumf %9, %10 : vector<8x256xf32>
    %c0_11 = arith.constant 0 : index
    %c0_12 = arith.constant 0 : index
    %12 = vector.load %arg6[%c0_11, %c0_12] : memref<256x256xf32, #tpu.memory_space<vmem>>, vector<256x256xf32>
    %cst_13 = arith.constant dense<0.000000e+00> : vector<8x256xf32>
    %13 = tpu.matmul %11, %12, %cst_13 {dimension_numbers = #tpu.dot_dimension_numbers<[1], [0], [0], [1], [0, 0, 1, 1], [], []>} : vector<8x256xf32>, vector<256x256xf32>, vector<8x256xf32> -> vector<8x256xf32>
    %c0_14 = arith.constant 0 : index
    %c0_15 = arith.constant 0 : index
    %14 = vector.load %arg7[%c0_14, %c0_15] : memref<1x256xf32, #tpu.memory_space<vmem>>, vector<1x256xf32>
    %15 = vector.broadcast %14 : vector<1x256xf32> to vector<8x256xf32>
    %16 = arith.addf %13, %15 : vector<8x256xf32>
    %cst_16 = arith.constant 0.000000e+00 : f32
    %17 = vector.broadcast %cst_16 : f32 to vector<8x256xf32>
    %18 = arith.maximumf %16, %17 : vector<8x256xf32>
    %c0_17 = arith.constant 0 : index
    %c0_18 = arith.constant 0 : index
    %19 = vector.load %arg8[%c0_17, %c0_18] : memref<1x256xf32, #tpu.memory_space<vmem>>, vector<1x256xf32>
    %20 = vector.broadcast %19 : vector<1x256xf32> to vector<8x256xf32>
    %21 = arith.mulf %18, %20 : vector<8x256xf32>
    %cst_19 = arith.constant dense<0.000000e+00> : vector<8xf32>
    %22 = vector.multi_reduction <add>, %21, %cst_19 [1] : vector<8x256xf32> to vector<8xf32>
    %23 = vector.shape_cast %22 : vector<8xf32> to vector<8x1xf32>
    %c0_20 = arith.constant 0 : index
    %24 = memref.load %arg9[%c0_20] : memref<1xf32, #tpu.memory_space<smem>>
    %25 = vector.broadcast %24 : f32 to vector<8x1xf32>
    %26 = arith.addf %23, %25 : vector<8x1xf32>
    %c0_21 = arith.constant 0 : index
    %c0_22 = arith.constant 0 : index
    %27 = vector.load %arg10[%c0_21, %c0_22] : memref<8x1xf32, #tpu.memory_space<vmem>>, vector<8x1xf32>
    tpu.vector_store %arg10[%c0_21, %c0_22], %26 {strides = array<i32>} : memref<8x1xf32, #tpu.memory_space<vmem>>, vector<8x1xf32>,
    return
  }
  func.func @transform_0(%arg0: i32) -> (i32, i32) {
    %c0_i32 = arith.constant 0 : i32
    %c0_i32_0 = arith.constant 0 : i32
    return %arg0, %c0_i32 : i32, i32
  }
  func.func @transform_1(%arg0: i32) -> (i32, i32) {
    %c0_i32 = arith.constant 0 : i32
    %c0_i32_0 = arith.constant 0 : i32
    return %arg0, %c0_i32 : i32, i32
  }
  func.func @transform_2(%arg0: i32) -> (i32, i32) {
    %c0_i32 = arith.constant 0 : i32
    %c0_i32_0 = arith.constant 0 : i32
    %c0_i32_1 = arith.constant 0 : i32
    return %c0_i32, %c0_i32_0 : i32, i32
  }
  func.func @transform_3(%arg0: i32) -> (i32, i32) {
    %c0_i32 = arith.constant 0 : i32
    %c0_i32_0 = arith.constant 0 : i32
    %c0_i32_1 = arith.constant 0 : i32
    return %c0_i32, %c0_i32_0 : i32, i32
  }
  func.func @transform_4(%arg0: i32) -> (i32, i32) {
    %c0_i32 = arith.constant 0 : i32
    %c0_i32_0 = arith.constant 0 : i32
    %c0_i32_1 = arith.constant 0 : i32
    return %c0_i32, %c0_i32_0 : i32, i32
  }
  func.func @transform_5(%arg0: i32) -> (i32, i32) {
    %c0_i32 = arith.constant 0 : i32
    %c0_i32_0 = arith.constant 0 : i32
    %c0_i32_1 = arith.constant 0 : i32
    return %c0_i32, %c0_i32_0 : i32, i32
  }
  func.func @transform_6(%arg0: i32) -> (i32, i32) {
    %c0_i32 = arith.constant 0 : i32
    %c0_i32_0 = arith.constant 0 : i32
    %c0_i32_1 = arith.constant 0 : i32
    return %c0_i32, %c0_i32_0 : i32, i32
  }
  func.func @transform_7(%arg0: i32) -> (i32, i32) {
    %c0_i32 = arith.constant 0 : i32
    %c0_i32_0 = arith.constant 0 : i32
    %c0_i32_1 = arith.constant 0 : i32
    return %c0_i32, %c0_i32_0 : i32, i32
  }
  func.func @transform_8(%arg0: i32) -> i32 {
    %c0_i32 = arith.constant 0 : i32
    %c0_i32_0 = arith.constant 0 : i32
    return %c0_i32 : i32
  }
  func.func @transform_9(%arg0: i32) -> (i32, i32) {
    %c0_i32 = arith.constant 0 : i32
    %c0_i32_0 = arith.constant 0 : i32
    return %arg0, %c0_i32 : i32, i32
  }
}

</mosaic_0001>

<bundles_post_ra>
// kernel: tpu_custom_call.1
= control target key start
LH: loop header
LB: loop body
LE: loop exit
PB: predicated region body
PF: predicated region fallthrough
CT: control target
= control target key end

     0   :  { %15 = vsyncpa [#allocation4], 0  ;;  %s377_s12 = smov [#allocation3]   ;;  %s378_s14 = smov 256   ;;  %s468_s0 = inlined_call_operand.vmem [shape: f32[8,4], index: 0, kind: input, shape index: {}]   ;;  %s469_s1 = inlined_call_operand.vmem [shape: f32[8,4], index: 1, kind: input, shape index: {}]   ;;  %s470_s2 = inlined_call_operand.vmem [shape: f32[4,256], index: 2, kind: input, shape index: {}]   ;;  %s471_s3 = inlined_call_operand.vmem [shape: f32[4,256], index: 3, kind: input, shape index: {}]   ;;  %s472_s4 = inlined_call_operand.vmem [shape: f32[1,256], index: 4, kind: input, shape index: {}]   ;;  %s473_s5 = inlined_call_operand.hbm [shape: f32[256,256], index: 5, kind: input, shape index: {}]   ;;  %s474_s6 = inlined_call_operand.vmem [shape: f32[1,256], index: 6, kind: input, shape index: {}]   ;;  %s475_s7 = inlined_call_operand.vmem [shape: f32[1,256], index: 7, kind: input, shape index: {}]   ;;  %s476_s8 = inlined_call_operand.<no memory space> [shape: f32[1], index: 8, kind: input, shape index: {}]   ;;  %s477_s9 = inlined_call_operand.vmem [shape: f32[8,1], index: 9, kind: output, shape index: {}]  }
   0x1   :  { %s30_s11 = sshll.u32 %s473_s5, 4  ;;  %s32_s13 = sshll.u32 %s377_s12, 4  ;;  %s31_s11 = int_to_ptr.hbm [resolvable:$true] %s30_s11  ;;  %s33_s13 = int_to_ptr.vmem [resolvable:$true] %s32_s13 }
   0x2   :  { %s379_s15 = smov 16  }
   0x3   :  { %38 = dma.hbm_to_vmem [thread:$0]  %s31_s11, 8192, %s33_s13, [#allocation4], %s378_s14, %s378_s14, %s379_s15  }
   0x4   :  { %375 = dma.done.wait [#allocation4], 8192  }
   0x5   :  { %376 = vsyncadd [#allocation4], 4294959104  ;;  %v52_v0 = vld [vmem:[%s471_s3] sm:$0xff]  ;;  %vm61_vm0 = vcmask 1043456   ;;  %v197_v3 = vld [vmem:[#allocation3 + $0xf0] sm:$0xff]  ;;  %vm57_vm1 = vcmask 31744  }
   0x6   :  { %54 = vst [vmem:[#allocation1] ss:$2 sm:$0xff] %v52_v0  ;;  %v50_v1 = vld [vmem:[%s470_s2] sm:$0xff]  ;;  %v229_v4 = vld [vmem:[#allocation3 + $0x1f0] sm:$0xff]  ;;  %v195_v7 = vld [vmem:[#allocation3 + $0xe0] sm:$0xff]  ;;  %vm333_vm2 = vcmask 7168  }
   0x7   :  { %v51_v2 = vld [vmem:[%s469_s1] sm:$0xff]  ;;  %v227_v8 = vld [vmem:[#allocation3 + $0x1e0] sm:$0xff]  ;;  %v193_v9 = vld [vmem:[#allocation3 + $0xd0] sm:$0xff] }
   0x8   :  { %v225_v10 = vld [vmem:[#allocation3 + $0x1d0] sm:$0xff]  ;;  %v49_v11 = vld [vmem:[%s468_s0] sm:$0xff]  ;;  %v191_v16 = vld [vmem:[#allocation3 + $0xc0] sm:$0xff] }
   0x9   :  { %v198_v12 = vld [vmem:[#allocation3 + $0xf8] sm:$0xff]  ;;  %v223_v17 = vld [vmem:[#allocation3 + $0x1c0] sm:$0xff]  ;;  %v196_v18 = vld [vmem:[#allocation3 + $0xe8] sm:$0xff] }
   0xa   :  { %v230_v13 = vld [vmem:[#allocation3 + $0x1f8] sm:$0xff]  ;;  %v228_v19 = vld [vmem:[#allocation3 + $0x1e8] sm:$0xff]  ;;  %v189_v20 = vld [vmem:[#allocation3 + $0xb0] sm:$0xff] }
   0xb   :  { %v221_v21 = vld [vmem:[#allocation3 + $0x1b0] sm:$0xff]  ;;  %v194_v22 = vld [vmem:[#allocation3 + $0xd8] sm:$0xff]  ;;  %v187_v24 = vld [vmem:[#allocation3 + $0xa0] sm:$0xff] }
   0xc   :  { %v226_v23 = vld [vmem:[#allocation3 + $0x1d8] sm:$0xff]  ;;  %v219_v25 = vld [vmem:[#allocation3 + $0x1a0] sm:$0xff]  ;;  %v192_v26 = vld [vmem:[#allocation3 + $0xc8] sm:$0xff] }
   0xd   :  { %v55_v5 = vld.sshfl [vmem:[#allocation1] sm:$0xff pattern:$0x75316420]  ;;  %v56_v6 = vld.sshfl [vmem:[#allocation1 + $0x8] sm:$0xff pattern:$0x75316420] }
   0xe   :  { %107 = vst [vmem:[#allocation1] ss:$2 sm:$0xff] %v50_v1  ;;  %340 = vmatpush.msk.msra.mxu0 %vm61_vm0, %v55_v5  ;;  %342 = vmatpush.msk.msra.mxu1 %vm61_vm0, %v56_v6  ;;  %v224_v27 = vld [vmem:[#allocation3 + $0x1c8] sm:$0xff]  ;;  %v185_v28 = vld [vmem:[#allocation3 + $0x90] sm:$0xff]  ;;  %v190_v30 = vld [vmem:[#allocation3 + $0xb8] sm:$0xff] }
   0xf   :  { %341 = vmatmul.msk.f32.vlgmr.msra.gmra.mxu0 %vm57_vm1, %v51_v2  ;;  %343 = vmatmul.msk.f32.vlgmr.msra.gmra.mxu1 %vm57_vm1, %v51_v2  ;;  %v217_v29 = vld [vmem:[#allocation3 + $0x190] sm:$0xff]  ;;  %v222_v31 = vld [vmem:[#allocation3 + $0x1b8] sm:$0xff]  ;;  %v183_v32 = vld [vmem:[#allocation3 + $0x80] sm:$0xff] }
  0x10   :  { %237 = vmatpush.msrb.mxu0 %v197_v3  ;;  %257 = vmatpush.msrb.mxu1 %v229_v4  ;;  %v215_v33 = vld [vmem:[#allocation3 + $0x180] sm:$0xff]  ;;  %v188_v34 = vld [vmem:[#allocation3 + $0xa8] sm:$0xff]  ;;  %v181_v36 = vld [vmem:[#allocation3 + $0x70] sm:$0xff] }
  0x11   :  { %v220_v35 = vld [vmem:[#allocation3 + $0x1a8] sm:$0xff]  ;;  %v213_v37 = vld [vmem:[#allocation3 + $0x170] sm:$0xff]  ;;  %v186_v38 = vld [vmem:[#allocation3 + $0x98] sm:$0xff] }
  0x12   :  { %238 = vmatpush.msrb.mxu0 %v195_v7  ;;  %258 = vmatpush.msrb.mxu1 %v227_v8  ;;  %v218_v39 = vld [vmem:[#allocation3 + $0x198] sm:$0xff]  ;;  %v179_v40 = vld [vmem:[#allocation3 + $0x60] sm:$0xff]  ;;  %v184_v42 = vld [vmem:[#allocation3 + $0x88] sm:$0xff] }
  0x13   :  { %v211_v41 = vld [vmem:[#allocation3 + $0x160] sm:$0xff]  ;;  %v216_v43 = vld [vmem:[#allocation3 + $0x188] sm:$0xff]  ;;  %v177_v44 = vld [vmem:[#allocation3 + $0x50] sm:$0xff] }
  0x14   :  { %239 = vmatpush.msrb.mxu0 %v193_v9  ;;  %259 = vmatpush.msrb.mxu1 %v225_v10  ;;  %v209_v45 = vld [vmem:[#allocation3 + $0x150] sm:$0xff]  ;;  %v182_v46 = vld [vmem:[#allocation3 + $0x78] sm:$0xff]  ;;  %v175_v48 = vld [vmem:[#allocation3 + $0x40] sm:$0xff] }
  0x15   :  { %v108_v14 = vld.sshfl [vmem:[#allocation1] sm:$0xff pattern:$0x75316420]  ;;  %v109_v15 = vld.sshfl [vmem:[#allocation1 + $0x8] sm:$0xff pattern:$0x75316420] }
  0x16   :  { %344 = vmatpush.msk.msra.mxu2 %vm61_vm0, %v108_v14  ;;  %346 = vmatpush.msk.msra.mxu3 %vm61_vm0, %v109_v15  ;;  %v214_v47 = vld [vmem:[#allocation3 + $0x178] sm:$0xff]  ;;  %v180_v49 = vld [vmem:[#allocation3 + $0x68] sm:$0xff]  ;;  %v173_v54 = vld [vmem:[#allocation3 + $0x30] sm:$0xff] }
  0x17   :  { %345 = vmatmul.msk.f32.vlgmr.msra.gmra.mxu2 %vm57_vm1, %v49_v11  ;;  %347 = vmatmul.msk.f32.vlgmr.msra.gmra.mxu3 %vm57_vm1, %v49_v11  ;;  %v212_v50 = vld [vmem:[#allocation3 + $0x168] sm:$0xff]  ;;  %v178_v51 = vld [vmem:[#allocation3 + $0x58] sm:$0xff]  ;;  %v207_v55 = vld [vmem:[#allocation3 + $0x140] sm:$0xff] }
  0x18   :  { %277 = vmatpush.msrb.mxu2 %v198_v12  ;;  %297 = vmatpush.msrb.mxu3 %v230_v13  ;;  %v210_v52 = vld [vmem:[#allocation3 + $0x158] sm:$0xff]  ;;  %v176_v53 = vld [vmem:[#allocation3 + $0x48] sm:$0xff]  ;;  %v171_v58 = vld [vmem:[#allocation3 + $0x20] sm:$0xff] }
  0x19   :  { %240 = vmatpush.msrb.mxu0 %v191_v16  ;;  %260 = vmatpush.msrb.mxu1 %v223_v17  ;;  %v174_v56 = vld [vmem:[#allocation3 + $0x38] sm:$0xff]  ;;  %v208_v57 = vld [vmem:[#allocation3 + $0x148] sm:$0xff]  ;;  %v205_v59 = vld [vmem:[#allocation3 + $0x130] sm:$0xff] }
  0x1a   :  { %278 = vmatpush.msrb.mxu2 %v196_v18  ;;  %298 = vmatpush.msrb.mxu3 %v228_v19  ;;  %v172_v60 = vld [vmem:[#allocation3 + $0x28] sm:$0xff]  ;;  %v206_v61 = vld [vmem:[#allocation3 + $0x138] sm:$0xff]  ;;  %v169_v62 = vld [vmem:[#allocation3 + $0x10] sm:$0xff] }
  0x1b   :  { %241 = vmatpush.msrb.mxu0 %v189_v20  ;;  %261 = vmatpush.msrb.mxu1 %v221_v21  ;;  %v203_v63 = vld [vmem:[#allocation3 + $0x120] sm:$0xff]  ;;  %v170_v0 = vld [vmem:[#allocation3 + $0x18] sm:$0xff]  ;;  %v204_v1 = vld [vmem:[#allocation3 + $0x128] sm:$0xff] }
  0x1c   :  { %279 = vmatpush.msrb.mxu2 %v194_v22  ;;  %299 = vmatpush.msrb.mxu3 %v226_v23  ;;  %v167_v2 = vld [vmem:[#allocation3] sm:$0xff]  ;;  %v201_v3 = vld [vmem:[#allocation3 + $0x110] sm:$0xff]  ;;  %v168_v4 = vld [vmem:[#allocation3 + $0x8] sm:$0xff] }
  0x1d   :  { %242 = vmatpush.msrb.mxu0 %v187_v24  ;;  %262 = vmatpush.msrb.mxu1 %v219_v25  ;;  %v202_v5 = vld [vmem:[#allocation3 + $0x118] sm:$0xff]  ;;  %v199_v6 = vld [vmem:[#allocation3 + $0x100] sm:$0xff]  ;;  %v200_v7 = vld [vmem:[#allocation3 + $0x108] sm:$0xff] }
  0x1e   :  { %280 = vmatpush.msrb.mxu2 %v192_v26  ;;  %300 = vmatpush.msrb.mxu3 %v224_v27  ;;  %v157_v8 = vld [vmem:[%s472_s4] sm:$0x3] }
  0x1f   :  { %243 = vmatpush.msrb.mxu0 %v185_v28  ;;  %263 = vmatpush.msrb.mxu1 %v217_v29  ;;  %v159_v11 = vperm.slane %v157_v8, 0  ;;  %v160_v12 = vperm.slane %v157_v8, 1  ;;  %v231_v21 = vld [vmem:[%s474_s6] sm:$0x3] }
  0x20   :  { %281 = vmatpush.msrb.mxu2 %v190_v30  ;;  %301 = vmatpush.msrb.mxu3 %v222_v31  ;;  %v233_v22 = vperm.slane %v231_v21, 0  ;;  %v234_v26 = vperm.slane %v231_v21, 1  ;;  %v319_v29 = vld [vmem:[%s475_s7] sm:$0x3] }
  0x21   :  { %244 = vmatpush.msrb.mxu0 %v183_v32  ;;  %264 = vmatpush.msrb.mxu1 %v215_v33 }
  0x22   :  { %282 = vmatpush.msrb.mxu2 %v188_v34  ;;  %302 = vmatpush.msrb.mxu3 %v220_v35  ;;  %v321_v34 = vperm.slane %v319_v29, 0  ;;  %v322_v35 = vperm.slane %v319_v29, 1 }
  0x23   :  { %245 = vmatpush.msrb.mxu0 %v181_v36  ;;  %265 = vmatpush.msrb.mxu1 %v213_v37 }
  0x24   :  { %283 = vmatpush.msrb.mxu2 %v186_v38  ;;  %303 = vmatpush.msrb.mxu3 %v218_v39 }
  0x25   :  { %246 = vmatpush.msrb.mxu0 %v179_v40  ;;  %266 = vmatpush.msrb.mxu1 %v211_v41  ;;  %v331_v40 = vstv %s476_s8 }
  0x26   :  { %284 = vmatpush.msrb.mxu2 %v184_v42  ;;  %304 = vmatpush.msrb.mxu3 %v216_v43 }
  0x27   :  { %247 = vmatpush.msrb.mxu0 %v177_v44  ;;  %267 = vmatpush.msrb.mxu1 %v209_v45 }
  0x28   :  { %285 = vmatpush.msrb.mxu2 %v182_v46  ;;  %305 = vmatpush.msrb.mxu3 %v214_v47 }
  0x29   :  { %248 = vmatpush.msrb.mxu0 %v175_v48  ;;  %268 = vmatpush.msrb.mxu1 %v207_v55 }
  0x2a   :  { %286 = vmatpush.msrb.mxu2 %v180_v49  ;;  %306 = vmatpush.msrb.mxu3 %v212_v50 }
  0x2b   :  { %249 = vmatpush.msrb.mxu0 %v173_v54  ;;  %269 = vmatpush.msrb.mxu1 %v205_v59 }
  0x2c   :  { %287 = vmatpush.msrb.mxu2 %v178_v51  ;;  %307 = vmatpush.msrb.mxu3 %v210_v52 }
  0x2d   :  { %250 = vmatpush.msrb.mxu0 %v171_v58  ;;  %270 = vmatpush.msrb.mxu1 %v203_v63 }
  0x2e   :  { %288 = vmatpush.msrb.mxu2 %v176_v53  ;;  %308 = vmatpush.msrb.mxu3 %v208_v57 }
  0x2f   :  { %251 = vmatpush.msrb.mxu0 %v169_v62  ;;  %271 = vmatpush.msrb.mxu1 %v201_v3 }
  0x30   :  { %289 = vmatpush.msrb.mxu2 %v174_v56  ;;  %309 = vmatpush.msrb.mxu3 %v206_v61 }
  0x31   :  { %252 = vmatpush.msrb.mxu0 %v167_v2  ;;  %272 = vmatpush.msrb.mxu1 %v199_v6 }
  0x32   :  { %290 = vmatpush.msrb.mxu2 %v172_v60  ;;  %310 = vmatpush.msrb.mxu3 %v204_v1 }
  0x34   :  { %291 = vmatpush.msrb.mxu2 %v170_v0  ;;  %311 = vmatpush.msrb.mxu3 %v202_v5 }
  0x36   :  { %292 = vmatpush.msrb.mxu2 %v168_v4  ;;  %312 = vmatpush.msrb.mxu3 %v200_v7 }
  0x8c   :  { %v83_v9 = vpop.f32.mrf.mxu0  ;;  %v103_v10 = vpop.f32.mrf.mxu1 }
  0x9a   :  { %v134_v13 = vpop.f32.mrf.mxu2  ;;  %v154_v14 = vpop.f32.mrf.mxu3 }
  0x9b   :  { %v135_v15 = vadd.f32 %v134_v13, %v83_v9  ;;  %v155_v16 = vadd.f32 %v154_v14, %v103_v10 }
  0x9d   :  { %v163_v17 = vadd.f32 %v159_v11, %v135_v15  ;;  %v164_v18 = vadd.f32 %v160_v12, %v155_v16 }
  0x9f   :  { %v165_v19 = vmax.f32 %v163_v17, 0.0  ;;  %v166_v20 = vmax.f32 %v164_v18, 0.0 }
  0xa1   :  { %253 = vmatmul.f32.vlgmr.msrb.gmra.mxu0 %v165_v19  ;;  %293 = vmatmul.f32.vlgmr.msrb.gmra.mxu2 %v165_v19 }
  0xa2   :  { %273 = vmatmul.f32.vlgmr.msrb.gmra.mxu1 %v166_v20  ;;  %313 = vmatmul.f32.vlgmr.msrb.gmra.mxu3 %v166_v20 }
 0x11e   :  { %v254_v23 = vpop.f32.mrf.mxu0 }
 0x11f   :  { %v255_v24 = vadd.f32 %v254_v23, %v233_v22  ;;  %v274_v25 = vpop.f32.mrf.mxu1 }
 0x121   :  { %v275_v27 = vadd.f32 %v274_v25, %v255_v24 }
 0x123   :  { %v317_v32 = vmax.f32 %v275_v27, 0.0 }
 0x124   :  { %v294_v28 = vpop.f32.mrf.mxu2 }
 0x125   :  { %v295_v30 = vadd.f32 %v294_v28, %v234_v26  ;;  %v314_v31 = vpop.f32.mrf.mxu3  ;;  %v325_v37 = vmul.f32 %v321_v34, %v317_v32 }
 0x127   :  { %v315_v33 = vadd.f32 %v314_v31, %v295_v30 }
 0x129   :  { %v318_v36 = vmax.f32 %v315_v33, 0.0 }
 0x12b   :  { %v326_v38 = vmul.f32 %v322_v35, %v318_v36 }
 0x12d   :  { %v327_v39 = vadd.f32 %v326_v38, %v325_v37 }
 0x12f   :  { %328 = vadd.xlane.f32.xlu0 %v327_v39 }
 0x1a2   :  { %v329_v41 = vpop.xlane.xlu0 %328 }
 0x1a3   :  { %v332_v42 = vadd.f32 %v331_v40, %v329_v41 }
 0x1a5   :  { %334 = vst.msk [vmem:[%s477_s9] sm:$0xff] %vm333_vm2, %v332_v42 }
 0x1a6   :  { %339 = vsyncpa [#allocation4], 1 }

</bundles_post_ra>
